<compile_context>
chip_gen: v5e
topology: v5e:2x2
jax: 0.10.0
libtpu: 0.0.40
codegen_flags: <defaults>
</compile_context>

<pallas_src>
import jax
import jax.numpy as jnp
from jax.experimental import pallas as pl
from jax.experimental.pallas import tpu as pltpu

_MASK_VALUE = -1e30
_LANE = 128


def _vmem_estimate(n_pad, d, ph, tn, out_bytes):
    x_blk = n_pad * d * 2 * 2            # bf16 input block, double-buffered
    w_blk = d * ph * 2 * 2               # bf16 weight block, double-buffered
    o_blk = n_pad * tn * out_bytes * 2   # output block, double-buffered
    xw_scr = n_pad * ph * 2              # persistent bf16 scratch
    interm = n_pad * tn * 4 * 3          # gram / exp / temporaries (f32)
    return x_blk + w_blk + o_blk + xw_scr + interm


def _pick_col_block(n_pad, d, ph, out_bytes, budget):
    """Largest multiple-of-128 column tile dividing n_pad that fits the budget."""
    for tn in (512, 256, 128):
        if n_pad % tn == 0 and _vmem_estimate(n_pad, d, ph, tn, out_bytes) <= budget:
            return tn
    # TODO(synk): for huge ctx_size also row-tile the strip (online column sum)
    # instead of relying on TN=128 alone to fit the VMEM budget.
    return 128


def _make_kernel(n_real, n_pad, tn):
    def kernel(x_ref, w_ref, o_ref, xw_ref):
        # x_ref: (1, n_pad, D) bf16   w_ref: (D, P*H) bf16
        # o_ref: (1, n_pad, tn)       xw_ref: (n_pad, P*H) bf16 scratch
        col = pl.program_id(1)

        # relu(x @ W_all): once per batch block, reused by every column tile.
        @pl.when(col == 0)
        def _():
            xw = jnp.dot(x_ref[0], w_ref[...],
                         preferred_element_type=jnp.float32)        # (n_pad, PH) f32
            xw_ref[...] = jnp.maximum(xw, 0.0).astype(jnp.bfloat16)

        xw = xw_ref[...]                                             # (n_pad, PH) bf16
        start = pl.multiple_of(col * tn, tn)
        xw_col = xw_ref[pl.ds(start, tn), :]                         # (tn, PH) bf16

        # NT-form Gram strip: xw @ xw_col^T without materializing a transpose.
        # TODO(synk): confirm via pl.lower_as_mlir that this contracts lanes
        # directly (no vxpose of xw_col ahead of the vmatmul).
        gram = jax.lax.dot_general(
            xw, xw_col,
            dimension_numbers=(((1,), (1,)), ((), ())),
            preferred_element_type=jnp.float32)                      # (n_pad, tn) f32

        if n_pad != n_real:
            rows = jax.lax.broadcasted_iota(jnp.int32, (n_pad, tn), 0)
            gram = jnp.where(rows < n_real, gram, _MASK_VALUE)

        # softmax over dim=1 of (B, N, N) == the row axis of this strip.
        m = jnp.max(gram, axis=0, keepdims=True)
        e = jnp.exp(gram - m)
        s = jnp.sum(e, axis=0, keepdims=True)
        o_ref[0] = (e * pl.reciprocal(s, approx=False)).astype(o_ref.dtype)

    return kernel


def sem_graph_learner_attention(context, weights, *, col_block=None,
                                out_dtype=jnp.float32,
                                vmem_budget_bytes=44 * 1024 * 1024):
    """context: (B, N, D) float32; weights: (num_pers, H, D) (PyTorch Linear layout)."""
    B, N, D = context.shape
    P, H, _ = weights.shape
    PH = P * H
    out_bytes = jnp.dtype(out_dtype).itemsize

    # Lane-dense ctx axis: pad to a multiple of 128 (padded rows masked in-kernel,
    # padded rows/cols sliced off afterwards).
    n_pad = pl.cdiv(N, _LANE) * _LANE
    if n_pad != N:
        context = jnp.pad(context, ((0, 0), (0, n_pad - N), (0, 0)))
    x_bf16 = context.astype(jnp.bfloat16)

    # Fuse perspectives into one (D, P*H) weight and fold the 1/P mean
    # (the Gram is degree-2 in W through the positive-homogeneous ReLU).
    w_all = (jnp.transpose(weights, (2, 0, 1)).reshape(D, PH)
             * (1.0 / float(P)) ** 0.5).astype(jnp.bfloat16)

    tn = col_block if col_block is not None else _pick_col_block(
        n_pad, D, PH, out_bytes, vmem_budget_bytes)
    n_col = n_pad // tn

    est = _vmem_estimate(n_pad, D, PH, tn, out_bytes)
    vmem_limit = int(min(max(est + 12 * 1024 * 1024, 32 * 1024 * 1024),
                         56 * 1024 * 1024))

    out_padded = pl.pallas_call(
        _make_kernel(N, n_pad, tn),
        out_shape=jax.ShapeDtypeStruct((B, n_pad, n_pad), out_dtype),
        grid_spec=pltpu.PrefetchScalarGridSpec(
            num_scalar_prefetch=0,
            grid=(B, n_col),
            in_specs=[
                pl.BlockSpec((1, n_pad, D), lambda b, c: (b, 0, 0)),
                # TODO(synk): single-buffer this constant-index weight block
                # (pipeline_mode=pl.Buffered(1)) once its size matters.
                pl.BlockSpec((D, PH), lambda b, c: (0, 0)),
            ],
            out_specs=pl.BlockSpec((1, n_pad, tn), lambda b, c: (b, 0, c)),
            scratch_shapes=[pltpu.VMEM((n_pad, PH), jnp.bfloat16)],
        ),
        compiler_params=pltpu.CompilerParams(
            dimension_semantics=("parallel", "arbitrary"),
            vmem_limit_bytes=vmem_limit),
    )(x_bf16, w_all)

    return out_padded[:, :N, :N]


def _reference(context, weights):
    """Plain-JAX f32 reference matching the PyTorch forward exactly."""
    num_pers = weights.shape[0]
    att = 0.0
    for p in range(num_pers):
        fc = jax.nn.relu(jnp.einsum('bnd,hd->bnh', context, weights[p]))
        att = att + jnp.einsum('bnh,bmh->bnm', fc, fc)
    att = att / num_pers
    return jax.nn.softmax(att, axis=1)


if __name__ == "__main__":
    # Small shapes consistent with the module's forward signature.
    B, N, D, H, NUM_PERS = 2, 8, 16, 32, 16

    key = jax.random.PRNGKey(0)
    k_x, k_w = jax.random.split(key)
    context = jax.random.normal(k_x, (B, N, D), dtype=jnp.float32)
    # Deterministic xavier-ish init for the num_pers Linear(D -> H, bias=False) weights.
    bound = (6.0 / (D + H)) ** 0.5
    weights = jax.random.uniform(k_w, (NUM_PERS, H, D), dtype=jnp.float32,
                                 minval=-bound, maxval=bound)

    out = sem_graph_learner_attention(context, weights)
    out = jax.block_until_ready(out)

    ref = _reference(context, weights)
    assert out.shape == (B, N, N)
    # bf16 MXU operands -> looser tolerance than pure f32.
    assert jnp.allclose(out, ref, atol=3e-2, rtol=3e-2)
    # Sanity: softmax over dim=1 -> columns sum to ~1 (full-precision reciprocal).
    assert jnp.allclose(out.sum(axis=1), 1.0, atol=1e-3)

    print("KERNEL_OK")
</pallas_src>

<mosaic_0001>
module attributes {stable_mosaic.version = 11 : i64} {
  func.func @kernel(%arg0: i32, %arg1: i32, %arg2: memref<1x128x16xbf16, #tpu.memory_space<vmem>>, %arg3: memref<16x512xbf16, #tpu.memory_space<vmem>>, %arg4: memref<1x128x128xf32, #tpu.memory_space<vmem>>, %arg5: memref<128x512xbf16, #tpu.memory_space<vmem>>) attributes {dimension_semantics = [#tpu.dimension_semantics<parallel>, #tpu.dimension_semantics<arbitrary>], iteration_bounds = array<i64: 2, 1>, scalar_prefetch = 0 : i64, scratch_operands = 1 : i64, tpu.core_type = #tpu.core_type<tc>, window_params = [{transform_indices = @transform_0, window_bounds = array<i64: 1, 128, 16>}, {pipeline_mode = #tpu.pipeline_mode<synchronous>, transform_indices = @transform_1, window_bounds = array<i64: 16, 512>}, {transform_indices = @transform_2, window_bounds = array<i64: 1, 128, 128>}]} {
    %c0_i32 = arith.constant 0 : i32
    %0 = arith.cmpi eq, %arg1, %c0_i32 : i32
    %1 = arith.extui %0 : i1 to i32
    %c0_i32_0 = arith.constant 0 : i32
    %2 = arith.cmpi ne, %1, %c0_i32_0 : i32
    scf.if %2 {
      %c0_9 = arith.constant 0 : index
      %c0_10 = arith.constant 0 : index
      %c0_11 = arith.constant 0 : index
      %27 = vector.load %arg2[%c0_9, %c0_10, %c0_11] : memref<1x128x16xbf16, #tpu.memory_space<vmem>>, vector<1x128x16xbf16>
      %28 = vector.shape_cast %27 : vector<1x128x16xbf16> to vector<128x16xbf16>
      %c0_12 = arith.constant 0 : index
      %c0_13 = arith.constant 0 : index
      %29 = vector.load %arg3[%c0_12, %c0_13] : memref<16x512xbf16, #tpu.memory_space<vmem>>, vector<16x512xbf16>
      %cst_14 = arith.constant dense<0.000000e+00> : vector<128x512xf32>
      %30 = tpu.matmul %28, %29, %cst_14 {dimension_numbers = #tpu.dot_dimension_numbers<[1], [0], [0], [1], [0, 0, 1, 1], [], []>} : vector<128x16xbf16>, vector<16x512xbf16>, vector<128x512xf32> -> vector<128x512xf32>
      %cst_15 = arith.constant 0.000000e+00 : f32
      %31 = vector.broadcast %cst_15 : f32 to vector<128x512xf32>
      %32 = arith.maximumf %30, %31 : vector<128x512xf32>
      %33 = arith.truncf %32 : vector<128x512xf32> to vector<128x512xbf16>
      %c0_16 = arith.constant 0 : index
      %c0_17 = arith.constant 0 : index
      %34 = vector.load %arg5[%c0_16, %c0_17] : memref<128x512xbf16, #tpu.memory_space<vmem>>, vector<128x512xbf16>
      tpu.vector_store %arg5[%c0_16, %c0_17], %33 {strides = array<i32>} : memref<128x512xbf16, #tpu.memory_space<vmem>>, vector<128x512xbf16>,
    } else {
    }
    %c0 = arith.constant 0 : index
    %c0_1 = arith.constant 0 : index
    %3 = vector.load %arg5[%c0, %c0_1] : memref<128x512xbf16, #tpu.memory_space<vmem>>, vector<128x512xbf16>
    %c128_i32 = arith.constant 128 : i32
    %4 = arith.muli %arg1, %c128_i32 : i32
    %5 = tpu.assume_multiple %4, 128 : i32
    %6 = arith.index_cast %5 : i32 to index
    %c0_2 = arith.constant 0 : index
    %7 = vector.load %arg5[%6, %c0_2] : memref<128x512xbf16, #tpu.memory_space<vmem>>, vector<128x512xbf16>
    %cst = arith.constant dense<0.000000e+00> : vector<128x128xf32>
    %8 = tpu.matmul %3, %7, %cst {dimension_numbers = #tpu.dot_dimension_numbers<[1], [1], [0], [0], [0, 0, 1, 0], [], []>} : vector<128x512xbf16>, vector<128x512xbf16>, vector<128x128xf32> -> vector<128x128xf32>
    %9 = tpu.iota {dimensions = array<i32: 0>} : vector<128x128xi32>
    %c8_i32 = arith.constant 8 : i32
    %10 = vector.broadcast %c8_i32 : i32 to vector<128x128xi32>
    %11 = arith.cmpi slt, %9, %10 : vector<128x128xi32>
    %cst_3 = arith.constant -1.000000e+30 : f32
    %12 = vector.broadcast %cst_3 : f32 to vector<128x128xf32>
    %13 = arith.select %11, %8, %12 : vector<128x128xi1>, vector<128x128xf32>
    %cst_4 = arith.constant dense<0xFF800000> : vector<128xf32>
    %14 = vector.multi_reduction <maximumf>, %13, %cst_4 [0] : vector<128x128xf32> to vector<128xf32>
    %15 = vector.shape_cast %14 : vector<128xf32> to vector<1x128xf32>
    %16 = vector.broadcast %15 : vector<1x128xf32> to vector<128x128xf32>
    %17 = arith.subf %13, %16 : vector<128x128xf32>
    %18 = math.exp %17 : vector<128x128xf32>
    %cst_5 = arith.constant dense<0.000000e+00> : vector<128xf32>
    %19 = vector.multi_reduction <add>, %18, %cst_5 [0] : vector<128x128xf32> to vector<128xf32>
    %20 = vector.shape_cast %19 : vector<128xf32> to vector<1x128xf32>
    %21 = tpu.reciprocal %20 : vector<1x128xf32> -> vector<1x128xf32>
    %22 = vector.broadcast %21 : vector<1x128xf32> to vector<128x128xf32>
    %23 = arith.mulf %18, %22 : vector<128x128xf32>
    %c0_6 = arith.constant 0 : index
    %c0_7 = arith.constant 0 : index
    %c0_8 = arith.constant 0 : index
    %24 = vector.load %arg4[%c0_6, %c0_7, %c0_8] : memref<1x128x128xf32, #tpu.memory_space<vmem>>, vector<1x128x128xf32>
    %25 = vector.shape_cast %24 : vector<1x128x128xf32> to vector<128x128xf32>
    %26 = vector.shape_cast %23 : vector<128x128xf32> to vector<1x128x128xf32>
    tpu.vector_store %arg4[%c0_6, %c0_7, %c0_8], %26 {strides = array<i32>} : memref<1x128x128xf32, #tpu.memory_space<vmem>>, vector<1x128x128xf32>,
    return
  }
  func.func @transform_0(%arg0: i32, %arg1: i32) -> (i32, i32, i32) {
    %c0_i32 = arith.constant 0 : i32
    %c0_i32_0 = arith.constant 0 : i32
    %c0_i32_1 = arith.constant 0 : i32
    return %arg0, %c0_i32, %c0_i32_0 : i32, i32, i32
  }
  func.func @transform_1(%arg0: i32, %arg1: i32) -> (i32, i32) {
    %c0_i32 = arith.constant 0 : i32
    %c0_i32_0 = arith.constant 0 : i32
    %c0_i32_1 = arith.constant 0 : i32
    return %c0_i32, %c0_i32_0 : i32, i32
  }
  func.func @transform_2(%arg0: i32, %arg1: i32) -> (i32, i32, i32) {
    %c0_i32 = arith.constant 0 : i32
    %c0_i32_0 = arith.constant 0 : i32
    return %arg0, %c0_i32, %arg1 : i32, i32, i32
  }
}

</mosaic_0001>

<bundles_post_ra>
// kernel: tpu_custom_call.1
= control target key start
LH: loop header
LB: loop body
LE: loop exit
PB: predicated region body
PF: predicated region fallthrough
CT: control target
= control target key end

     0   :  { %7 = vsyncpa [#allocation4], 0  ;;  %s2228_s0 = inlined_call_operand.vmem [shape: bf16[2,128,16], index: 0, kind: input, shape index: {}]   ;;  %s2229_s1 = inlined_call_operand.vmem [shape: bf16[16,512], index: 1, kind: input, shape index: {}]   ;;  %s2230_s2 = inlined_call_operand.hbm [shape: f32[2,128,128], index: 2, kind: output, shape index: {}]  }
   0x1   :  { %9 = vsyncpa [#allocation4 + $0x1], 0  ;;  %s2039_s9 = smov 0   ;;  %s2041_s10 = smov 0  }
   0x2   :  { %s2043_s11 = smov 0   ;;  %s2045_s12 = smov 0  }
   0x3   :  { %s2047_s13 = smov 0   ;;  %s2049_s14 = smov 0  }
   0x4 LB: > { %s1452_s15 = sadd.s32 4294967295, %s2020_s14   ;;  %s1453_s16 = sadd.s32 4294967294, %s2020_s14   ;;  %s2020_s14 = sphi %s2049_s14, %s15_s14   ;;  %s2016_s13 = sphi %s2047_s13, %s2237_s13   ;;  %s2012_s12 = sphi %s2045_s12, %s2236_s12   ;;  %s2008_s11 = sphi %s2043_s11, %s2235_s11   ;;  %s2004_s10 = sphi %s2041_s10, %s2234_s10   ;;  %s2000_s9 = sphi %s2039_s9, %s2233_s9  }
   0x5   : > { %s27_s17 = sadd.s32 1, %s2016_s13  ;;  %s83_s18 = sadd.s32 1, %s2008_s11 }
   0x6   : > { %p29_p0 = scmp.ge.s32.totalorder %s27_s17, 2  ;;  %p93_p1 = scmp.ne.s32.totalorder %s2008_s11, %s2004_s10 }
   0x7   : > { %p94_p2 = scmp.eq.s32.totalorder %s1452_s15, 1  ;;  %p99_p3 = scmp.ne.s32.totalorder %s2004_s10, %s2000_s9 }
   0x8   : > { %s2239_s17 = smov (%p29_p0, %s27_s17), 0  ;;  %p100_p5 = scmp.eq.s32.totalorder %s1453_s16, 1 }
   0x9   : > { %p2079_p4 = por %p94_p2, %p93_p1  ;;  %s78_s20 = ssub.s32 %s2016_s13, %s2239_s17 }
   0xa   : > { %p1456_p6 = scmp.ge.s32.totalorder %s2020_s14, 1  ;;  %p81_p7 = scmp.eq.s32.totalorder %s78_s20, 0 }
   0xb   : > { %p2086_p8 = por %p100_p5, %p99_p3  ;;  %p129_p9 = scmp.lt.s32.totalorder %s2020_s14, 3 }
   0xc   : > { %s2092_s22 = scalar_select %p81_p7, %s2008_s11, %s83_s18  }
   0xd   : > { %p130_p10 = pnand %p1456_p6, %p129_p9 }
   0xe   : > { %p151_p11 = scmp.lt.s32.totalorder (!%p130_p10), %s2012_s12, 1  ;;  %s148_s26 = sand.u32 (!%p130_p10), 1, %s2004_s10  }
   0xf   : > { %133 = sbr.rel (%p130_p10) target bundleno = 609 (0x261), region = 28  ;;  %s1457_s27 = sshll.u32 (!%p130_p10), %s148_s26, 7 }
  0x10   : > { %s150_s28 = scalar_lea.vmem (!%p130_p10), [#allocation3], %s1457_s27  ;;  %s1878_s29 = sshll.u32 (!%p130_p10), %s2012_s12, 7 }
  0x11   : > { %s1374_s4 = scalar_lea.hbm (!%p130_p10), %s2230_s2, %s1878_s29  ;;  %s1375_s5 = sshll.u32 (!%p130_p10), %s150_s28, 4  ;;  %s1376_s5 = int_to_ptr.vmem [resolvable:$true] %s1375_s5 }
  0x12   : > { %s1377_s6 = sshll.u32 (!%p130_p10), %s1374_s4, 4  ;;  %s1378_s6 = int_to_ptr.hbm [resolvable:$true] %s1377_s6 }
  0x13   : > { %s1956_s7 = sshra.s32 (!%p130_p10), %s1378_s6, 4  ;;  %s1957_s7 = int_to_ptr.hbm [resolvable:$true] %s1956_s7 }
  0x14   : > { %v1494_v0 = vld [vmem:[%s2229_s1] sm:$0xf]  ;;  %v1812_v1 = vld [vmem:[%s2229_s1 + $0xc] sm:$0xf0]  ;;  %v1810_v2 = vld [vmem:[%s2229_s1 + $0x4] sm:$0xf]  ;;  %p1963_p1 = scmp.lt.s32.totalorder %s1957_s7, %s2230_s2 }
  0x15   : > { %v1495_v3 = vor.u32 %v1812_v1, %v1494_v0  ;;  %v1496_v4 = vld [vmem:[%s2229_s1 + $0x10] sm:$0xf0]  ;;  %v1502_v5 = vld [vmem:[%s2229_s1 + $0x8] sm:$0xf]  ;;  %v1813_v6 = vld [vmem:[%s2229_s1 + $0x14] sm:$0xf0] }
  0x16   : > { %v1499_v7 = vor.u32 %v1810_v2, %v1496_v4  ;;  %v1503_v8 = vor.u32 %v1813_v6, %v1502_v5  ;;  %v1811_v9 = vld [vmem:[%s2229_s1 + $0xc] sm:$0xf]  ;;  %v1504_v10 = vld [vmem:[%s2229_s1 + $0x18] sm:$0xf0]  ;;  %s152_s18 = scalar_select %p151_p11, %s2012_s12, 1  ;;  %vm241_vm0 = vcmask 130048  }
  0x17   : > { %273 = vmatpush.bf16.msra.mxu0 %v1495_v3  ;;  %v1507_v11 = vor.u32 %v1811_v9, %v1504_v10  ;;  %s1362_s12 = scalar_lea.sflag [#allocation4], %s148_s26  ;;  %s1958_s8 = scalar_lea.hbm %s1957_s7, 128 }
  0x18   : > { %322 = vmatpush.bf16.msra.mxu1 %v1499_v7  ;;  %371 = vmatpush.bf16.msra.mxu2 %v1503_v8  ;;  %s1801_s20 = sshll.u32 %s152_s18, 6  ;;  %p1959_p12 = scmp.ne.s32.totalorder %s1957_s7, %s1958_s8 }
  0x19   : > { %420 = vmatpush.bf16.msra.mxu3 %v1507_v11  ;;  %s2123_s25 = scalar_lea.vmem %s2228_s0, %s1801_s20  ;;  %s1962_s18 = scalar_lea.hbm %s2230_s2, 256 }
  0x1a   : > { %v1802_v12 = vld [vmem:[%s2123_s25] sm:$0xff]  ;;  %v1803_v13 = vld [vmem:[%s2123_s25 + $0x8] sm:$0xff]  ;;  %v1804_v14 = vld [vmem:[%s2123_s25 + $0x10] sm:$0xff]  ;;  %p1960_p13 = pnand %p1959_p12, %p2079_p4  ;;  %p1964_p2 = scmp.lt.s32.totalorder %s1962_s18, %s1958_s8 }
  0x1b   : > { %1508 = vmatmul.msk.bf16.vlgmr.msra.gmra.mxu0 %vm241_vm0, %v1802_v12  ;;  %1516 = vmatmul.msk.bf16.vlgmr.msra.gmra.mxu1 %vm241_vm0, %v1802_v12  ;;  %v1805_v15 = vld [vmem:[%s2123_s25 + $0x18] sm:$0xff]  ;;  %v1806_v16 = vld [vmem:[%s2123_s25 + $0x20] sm:$0xff]  ;;  %v1807_v17 = vld [vmem:[%s2123_s25 + $0x28] sm:$0xff] }
  0x1c   : > { %1524 = vmatmul.msk.bf16.vlgmr.msra.gmra.mxu2 %vm241_vm0, %v1802_v12  ;;  %1532 = vmatmul.msk.bf16.vlgmr.msra.gmra.mxu3 %vm241_vm0, %v1802_v12  ;;  %v1808_v18 = vld [vmem:[%s2123_s25 + $0x30] sm:$0xff]  ;;  %v1809_v19 = vld [vmem:[%s2123_s25 + $0x38] sm:$0xff]  ;;  %p1961_p0 = pneg %p1960_p13  ;;  %p1965_p3 = por %p1964_p2, %p1963_p1 }
  0x1e   : > { %p1966_p5 = pnand %p1965_p3, %p1961_p0 }
  0x2b   : > { %1509 = vmatmul.msk.bf16.gmra.mxu0 %vm241_vm0, %v1803_v13  ;;  %1517 = vmatmul.msk.bf16.gmra.mxu1 %vm241_vm0, %v1803_v13 }
  0x2c   : > { %1525 = vmatmul.msk.bf16.gmra.mxu2 %vm241_vm0, %v1803_v13  ;;  %1533 = vmatmul.msk.bf16.gmra.mxu3 %vm241_vm0, %v1803_v13 }
  0x3b   : > { %1510 = vmatmul.msk.bf16.gmra.mxu0 %vm241_vm0, %v1804_v14  ;;  %1518 = vmatmul.msk.bf16.gmra.mxu1 %vm241_vm0, %v1804_v14 }
  0x3c   : > { %1526 = vmatmul.msk.bf16.gmra.mxu2 %vm241_vm0, %v1804_v14  ;;  %1534 = vmatmul.msk.bf16.gmra.mxu3 %vm241_vm0, %v1804_v14 }
  0x4b   : > { %1511 = vmatmul.msk.bf16.gmra.mxu0 %vm241_vm0, %v1805_v15  ;;  %1519 = vmatmul.msk.bf16.gmra.mxu1 %vm241_vm0, %v1805_v15 }
  0x4c   : > { %1527 = vmatmul.msk.bf16.gmra.mxu2 %vm241_vm0, %v1805_v15  ;;  %1535 = vmatmul.msk.bf16.gmra.mxu3 %vm241_vm0, %v1805_v15 }
  0x5b   : > { %1512 = vmatmul.msk.bf16.gmra.mxu0 %vm241_vm0, %v1806_v16  ;;  %1520 = vmatmul.msk.bf16.gmra.mxu1 %vm241_vm0, %v1806_v16 }
  0x5c   : > { %1528 = vmatmul.msk.bf16.gmra.mxu2 %vm241_vm0, %v1806_v16  ;;  %1536 = vmatmul.msk.bf16.gmra.mxu3 %vm241_vm0, %v1806_v16 }
  0x6b   : > { %1513 = vmatmul.msk.bf16.gmra.mxu0 %vm241_vm0, %v1807_v17  ;;  %1521 = vmatmul.msk.bf16.gmra.mxu1 %vm241_vm0, %v1807_v17 }
  0x6c   : > { %1529 = vmatmul.msk.bf16.gmra.mxu2 %vm241_vm0, %v1807_v17  ;;  %1537 = vmatmul.msk.bf16.gmra.mxu3 %vm241_vm0, %v1807_v17 }
  0x7b   : > { %1514 = vmatmul.msk.bf16.gmra.mxu0 %vm241_vm0, %v1808_v18  ;;  %1522 = vmatmul.msk.bf16.gmra.mxu1 %vm241_vm0, %v1808_v18 }
  0x7c   : > { %1530 = vmatmul.msk.bf16.gmra.mxu2 %vm241_vm0, %v1808_v18  ;;  %1538 = vmatmul.msk.bf16.gmra.mxu3 %vm241_vm0, %v1808_v18 }
  0x8b   : > { %1515 = vmatmul.msk.bf16.gmra.mxu0 %vm241_vm0, %v1809_v19  ;;  %1523 = vmatmul.msk.bf16.gmra.mxu1 %vm241_vm0, %v1809_v19 }
  0x8c   : > { %1531 = vmatmul.msk.bf16.gmra.mxu2 %vm241_vm0, %v1809_v19  ;;  %1539 = vmatmul.msk.bf16.gmra.mxu3 %vm241_vm0, %v1809_v19 }
  0x98   : > { %v275_v20 = vpop.f32.mrf.mxu0  ;;  %v324_v21 = vpop.f32.mrf.mxu1 }
  0x99   : > { %v462_v22 = vmax.f32 %v275_v20, 0.0  ;;  %v463_v23 = vmax.f32 %v324_v21, 0.0 }
  0x9b   : > { %v526_v24 = vpack.c.bf16 %v463_v23, %v462_v22 }
  0x9d   : > { %558 = vst [vmem:[#allocation2] sm:$0xff] %v526_v24 }
  0x9f   : > { %v373_v25 = vpop.f32.mrf.mxu2  ;;  %v422_v26 = vpop.f32.mrf.mxu3 }
  0xa0   : > { %v464_v27 = vmax.f32 %v373_v25, 0.0  ;;  %v465_v28 = vmax.f32 %v422_v26, 0.0  ;;  %v277_v29 = vpop.f32.mrf.mxu0  ;;  %v326_v30 = vpop.f32.mrf.mxu1 }
  0xa1   : > { %v466_v31 = vmax.f32 %v277_v29, 0.0  ;;  %v467_v32 = vmax.f32 %v326_v30, 0.0 }
  0xa2   : > { %v527_v33 = vpack.c.bf16 %v465_v28, %v464_v27 }
  0xa3   : > { %v528_v34 = vpack.c.bf16 %v467_v32, %v466_v31 }
  0xa4   : > { %559 = vst [vmem:[#allocation2 + $0x8] sm:$0xff] %v527_v33 }
  0xa5   : > { %560 = vst [vmem:[#allocation2 + $0x10] sm:$0xff] %v528_v34 }
  0xa7   : > { %v375_v35 = vpop.f32.mrf.mxu2  ;;  %v424_v36 = vpop.f32.mrf.mxu3 }
  0xa8   : > { %v468_v37 = vmax.f32 %v375_v35, 0.0  ;;  %v469_v38 = vmax.f32 %v424_v36, 0.0  ;;  %v280_v39 = vpop.f32.mrf.mxu0  ;;  %v329_v40 = vpop.f32.mrf.mxu1 }
  0xa9   : > { %v470_v41 = vmax.f32 %v280_v39, 0.0  ;;  %v471_v42 = vmax.f32 %v329_v40, 0.0 }
  0xaa   : > { %v529_v43 = vpack.c.bf16 %v469_v38, %v468_v37 }
  0xab   : > { %v530_v44 = vpack.c.bf16 %v471_v42, %v470_v41 }
  0xac   : > { %561 = vst [vmem:[#allocation2 + $0x18] sm:$0xff] %v529_v43 }
  0xad   : > { %562 = vst [vmem:[#allocation2 + $0x20] sm:$0xff] %v530_v44 }
  0xaf   : > { %v378_v45 = vpop.f32.mrf.mxu2  ;;  %v427_v46 = vpop.f32.mrf.mxu3 }
  0xb0   : > { %v472_v47 = vmax.f32 %v378_v45, 0.0  ;;  %v473_v48 = vmax.f32 %v427_v46, 0.0  ;;  %v282_v49 = vpop.f32.mrf.mxu0  ;;  %v331_v50 = vpop.f32.mrf.mxu1 }
  0xb1   : > { %v474_v51 = vmax.f32 %v282_v49, 0.0  ;;  %v475_v52 = vmax.f32 %v331_v50, 0.0 }
  0xb2   : > { %v531_v53 = vpack.c.bf16 %v473_v48, %v472_v47 }
  0xb3   : > { %v532_v54 = vpack.c.bf16 %v475_v52, %v474_v51 }
  0xb4   : > { %563 = vst [vmem:[#allocation2 + $0x28] sm:$0xff] %v531_v53 }
  0xb5   : > { %564 = vst [vmem:[#allocation2 + $0x30] sm:$0xff] %v532_v54 }
  0xb7   : > { %v380_v55 = vpop.f32.mrf.mxu2  ;;  %v429_v56 = vpop.f32.mrf.mxu3 }
  0xb8   : > { %v476_v57 = vmax.f32 %v380_v55, 0.0  ;;  %v477_v58 = vmax.f32 %v429_v56, 0.0  ;;  %v285_v59 = vpop.f32.mrf.mxu0  ;;  %v334_v60 = vpop.f32.mrf.mxu1 }
  0xb9   : > { %v478_v61 = vmax.f32 %v285_v59, 0.0  ;;  %v479_v62 = vmax.f32 %v334_v60, 0.0 }
  0xba   : > { %v533_v63 = vpack.c.bf16 %v477_v58, %v476_v57 }
  0xbb   : > { %v534_v0 = vpack.c.bf16 %v479_v62, %v478_v61 }
  0xbc   : > { %565 = vst [vmem:[#allocation2 + $0x38] sm:$0xff] %v533_v63 }
  0xbd   : > { %566 = vst [vmem:[#allocation2 + $0x40] sm:$0xff] %v534_v0 }
  0xbf   : > { %v383_v1 = vpop.f32.mrf.mxu2  ;;  %v432_v2 = vpop.f32.mrf.mxu3 }
  0xc0   : > { %v480_v3 = vmax.f32 %v383_v1, 0.0  ;;  %v481_v4 = vmax.f32 %v432_v2, 0.0  ;;  %v287_v5 = vpop.f32.mrf.mxu0  ;;  %v336_v6 = vpop.f32.mrf.mxu1 }
  0xc1   : > { %v482_v7 = vmax.f32 %v287_v5, 0.0  ;;  %v483_v8 = vmax.f32 %v336_v6, 0.0 }
  0xc2   : > { %v535_v9 = vpack.c.bf16 %v481_v4, %v480_v3 }
  0xc3   : > { %v536_v10 = vpack.c.bf16 %v483_v8, %v482_v7 }
  0xc4   : > { %567 = vst [vmem:[#allocation2 + $0x48] sm:$0xff] %v535_v9 }
  0xc5   : > { %568 = vst [vmem:[#allocation2 + $0x50] sm:$0xff] %v536_v10 }
  0xc7   : > { %v385_v11 = vpop.f32.mrf.mxu2  ;;  %v434_v12 = vpop.f32.mrf.mxu3 }
  0xc8   : > { %v484_v13 = vmax.f32 %v385_v11, 0.0  ;;  %v485_v14 = vmax.f32 %v434_v12, 0.0  ;;  %v290_v15 = vpop.f32.mrf.mxu0  ;;  %v339_v16 = vpop.f32.mrf.mxu1 }
  0xc9   : > { %v486_v17 = vmax.f32 %v290_v15, 0.0  ;;  %v487_v18 = vmax.f32 %v339_v16, 0.0 }
  0xca   : > { %v537_v19 = vpack.c.bf16 %v485_v14, %v484_v13 }
  0xcb   : > { %v538_v20 = vpack.c.bf16 %v487_v18, %v486_v17 }
  0xcc   : > { %569 = vst [vmem:[#allocation2 + $0x58] sm:$0xff] %v537_v19 }
  0xcd   : > { %570 = vst [vmem:[#allocation2 + $0x60] sm:$0xff] %v538_v20 }
  0xcf   : > { %v388_v21 = vpop.f32.mrf.mxu2  ;;  %v437_v22 = vpop.f32.mrf.mxu3 }
  0xd0   : > { %v488_v23 = vmax.f32 %v388_v21, 0.0  ;;  %v489_v24 = vmax.f32 %v437_v22, 0.0  ;;  %v292_v25 = vpop.f32.mrf.mxu0  ;;  %v341_v26 = vpop.f32.mrf.mxu1 }
  0xd1   : > { %v490_v27 = vmax.f32 %v292_v25, 0.0  ;;  %v491_v28 = vmax.f32 %v341_v26, 0.0 }
  0xd2   : > { %v539_v29 = vpack.c.bf16 %v489_v24, %v488_v23 }
  0xd3   : > { %v540_v30 = vpack.c.bf16 %v491_v28, %v490_v27 }
  0xd4   : > { %571 = vst [vmem:[#allocation2 + $0x68] sm:$0xff] %v539_v29 }
  0xd5   : > { %572 = vst [vmem:[#allocation2 + $0x70] sm:$0xff] %v540_v30 }
  0xd7   : > { %v390_v31 = vpop.f32.mrf.mxu2  ;;  %v439_v32 = vpop.f32.mrf.mxu3 }
  0xd8   : > { %v492_v33 = vmax.f32 %v390_v31, 0.0  ;;  %v493_v34 = vmax.f32 %v439_v32, 0.0  ;;  %v295_v35 = vpop.f32.mrf.mxu0  ;;  %v344_v36 = vpop.f32.mrf.mxu1 }
  0xd9   : > { %v494_v37 = vmax.f32 %v295_v35, 0.0  ;;  %v495_v38 = vmax.f32 %v344_v36, 0.0 }
  0xda   : > { %v541_v39 = vpack.c.bf16 %v493_v34, %v492_v33 }
  0xdb   : > { %v542_v40 = vpack.c.bf16 %v495_v38, %v494_v37 }
  0xdc   : > { %573 = vst [vmem:[#allocation2 + $0x78] sm:$0xff] %v541_v39 }
  0xdd   : > { %574 = vst [vmem:[#allocation2 + $0x80] sm:$0xff] %v542_v40 }
  0xdf   : > { %v393_v41 = vpop.f32.mrf.mxu2  ;;  %v442_v42 = vpop.f32.mrf.mxu3 }
  0xe0   : > { %v496_v43 = vmax.f32 %v393_v41, 0.0  ;;  %v497_v44 = vmax.f32 %v442_v42, 0.0  ;;  %v297_v45 = vpop.f32.mrf.mxu0  ;;  %v346_v46 = vpop.f32.mrf.mxu1 }
  0xe1   : > { %v498_v47 = vmax.f32 %v297_v45, 0.0  ;;  %v499_v48 = vmax.f32 %v346_v46, 0.0 }
  0xe2   : > { %v543_v49 = vpack.c.bf16 %v497_v44, %v496_v43 }
  0xe3   : > { %v544_v50 = vpack.c.bf16 %v499_v48, %v498_v47 }
  0xe4   : > { %575 = vst [vmem:[#allocation2 + $0x88] sm:$0xff] %v543_v49 }
  0xe5   : > { %576 = vst [vmem:[#allocation2 + $0x90] sm:$0xff] %v544_v50 }
  0xe7   : > { %v395_v51 = vpop.f32.mrf.mxu2  ;;  %v444_v52 = vpop.f32.mrf.mxu3 }
  0xe8   : > { %v500_v53 = vmax.f32 %v395_v51, 0.0  ;;  %v501_v54 = vmax.f32 %v444_v52, 0.0  ;;  %v300_v55 = vpop.f32.mrf.mxu0  ;;  %v349_v56 = vpop.f32.mrf.mxu1 }
  0xe9   : > { %v502_v57 = vmax.f32 %v300_v55, 0.0  ;;  %v503_v58 = vmax.f32 %v349_v56, 0.0 }
  0xea   : > { %v545_v59 = vpack.c.bf16 %v501_v54, %v500_v53 }
  0xeb   : > { %v546_v60 = vpack.c.bf16 %v503_v58, %v502_v57 }
  0xec   : > { %577 = vst [vmem:[#allocation2 + $0x98] sm:$0xff] %v545_v59 }
  0xed   : > { %578 = vst [vmem:[#allocation2 + $0xa0] sm:$0xff] %v546_v60 }
  0xef   : > { %v398_v61 = vpop.f32.mrf.mxu2  ;;  %v447_v62 = vpop.f32.mrf.mxu3 }
  0xf0   : > { %v504_v63 = vmax.f32 %v398_v61, 0.0  ;;  %v505_v0 = vmax.f32 %v447_v62, 0.0  ;;  %v302_v1 = vpop.f32.mrf.mxu0  ;;  %v351_v2 = vpop.f32.mrf.mxu1 }
  0xf1   : > { %v506_v3 = vmax.f32 %v302_v1, 0.0  ;;  %v507_v4 = vmax.f32 %v351_v2, 0.0 }
  0xf2   : > { %v547_v5 = vpack.c.bf16 %v505_v0, %v504_v63 }
  0xf3   : > { %v548_v6 = vpack.c.bf16 %v507_v4, %v506_v3 }
  0xf4   : > { %579 = vst [vmem:[#allocation2 + $0xa8] sm:$0xff] %v547_v5 }
  0xf5   : > { %580 = vst [vmem:[#allocation2 + $0xb0] sm:$0xff] %v548_v6 }
  0xf7   : > { %v400_v7 = vpop.f32.mrf.mxu2  ;;  %v449_v8 = vpop.f32.mrf.mxu3 }
  0xf8   : > { %v508_v9 = vmax.f32 %v400_v7, 0.0  ;;  %v509_v10 = vmax.f32 %v449_v8, 0.0  ;;  %v305_v11 = vpop.f32.mrf.mxu0  ;;  %v354_v12 = vpop.f32.mrf.mxu1  ;;  %v1750_v8 = vld [vmem:[#allocation2 + $0xa0] sm:$0xf] }
  0xf9   : > { %v510_v13 = vmax.f32 %v305_v11, 0.0  ;;  %v511_v14 = vmax.f32 %v354_v12, 0.0 }
  0xfa   : > { %v549_v15 = vpack.c.bf16 %v509_v10, %v508_v9  ;;  %v1866_v10 = vld [vmem:[#allocation2 + $0xa4] sm:$0xf] }
  0xfb   : > { %v550_v16 = vpack.c.bf16 %v511_v14, %v510_v13 }
  0xfc   : > { %581 = vst [vmem:[#allocation2 + $0xb8] sm:$0xff] %v549_v15  ;;  %v1868_v9 = vld [vmem:[#allocation2 + $0xac] sm:$0xf0]  ;;  %v1752_v11 = vld [vmem:[#allocation2 + $0xb0] sm:$0xf0] }
  0xfd   : > { %582 = vst [vmem:[#allocation2 + $0xc0] sm:$0xff] %v550_v16  ;;  %v1751_v16 = vor.u32 %v1868_v9, %v1750_v8  ;;  %v1694_v8 = vld [vmem:[#allocation2 + $0x28] sm:$0xf]  ;;  %v1851_v9 = vld [vmem:[#allocation2 + $0x2c] sm:$0xf] }
  0xff   : > { %v403_v17 = vpop.f32.mrf.mxu2  ;;  %v452_v18 = vpop.f32.mrf.mxu3 }
 0x100   : > { %v512_v19 = vmax.f32 %v403_v17, 0.0  ;;  %v513_v20 = vmax.f32 %v452_v18, 0.0  ;;  %v307_v21 = vpop.f32.mrf.mxu0  ;;  %v356_v22 = vpop.f32.mrf.mxu1  ;;  %v1755_v17 = vor.u32 %v1866_v10, %v1752_v11 }
 0x101   : > { %v514_v23 = vmax.f32 %v307_v21, 0.0  ;;  %v515_v24 = vmax.f32 %v356_v22, 0.0  ;;  %v1864_v21 = vld [vmem:[#allocation2 + $0x8c] sm:$0xf0]  ;;  %v1862_v22 = vld [vmem:[#allocation2 + $0x84] sm:$0xf] }
 0x102   : > { %v551_v25 = vpack.c.bf16 %v513_v20, %v512_v19  ;;  %v1734_v20 = vld [vmem:[#allocation2 + $0x80] sm:$0xf] }
 0x103   : > { %v552_v26 = vpack.c.bf16 %v515_v24, %v514_v23  ;;  %v1869_v18 = vld [vmem:[#allocation2 + $0xb4] sm:$0xf0]  ;;  %v1760_v19 = vld [vmem:[#allocation2 + $0xb8] sm:$0xf0]  ;;  %v1736_v23 = vld [vmem:[#allocation2 + $0x90] sm:$0xf0] }
 0x104   : > { %583 = vst [vmem:[#allocation2 + $0xc8] sm:$0xff] %v551_v25  ;;  %v1766_v58 = vld [vmem:[#allocation2 + $0xc0] sm:$0xf]  ;;  %v1870_v59 = vld [vmem:[#allocation2 + $0xc4] sm:$0xf] }
 0x105   : > { %584 = vst [vmem:[#allocation2 + $0xd0] sm:$0xff] %v552_v26  ;;  %v1758_v24 = vld [vmem:[#allocation2 + $0xa8] sm:$0xf]  ;;  %v1867_v25 = vld [vmem:[#allocation2 + $0xac] sm:$0xf] }
 0x106   : > { %v1759_v26 = vor.u32 %v1869_v18, %v1758_v24  ;;  %v1814_v18 = vld [vmem:[#allocation2 + $0x4] sm:$0xf] }
 0x107   : > { %v405_v27 = vpop.f32.mrf.mxu2  ;;  %v454_v28 = vpop.f32.mrf.mxu3 }
 0x108   : > { %v516_v29 = vmax.f32 %v405_v27, 0.0  ;;  %v517_v30 = vmax.f32 %v454_v28, 0.0  ;;  %v310_v31 = vpop.f32.mrf.mxu0  ;;  %v359_v32 = vpop.f32.mrf.mxu1  ;;  %v1763_v27 = vor.u32 %v1867_v25, %v1760_v19  ;;  %v1735_v28 = vor.u32 %v1864_v21, %v1734_v20  ;;  %v1544_v19 = vld [vmem:[#allocation2 + $0x10] sm:$0xf0]  ;;  %v1678_v20 = vld [vmem:[#allocation2 + $0x8] sm:$0xf] }
 0x109   : > { %v518_v33 = vmax.f32 %v310_v31, 0.0  ;;  %v519_v34 = vmax.f32 %v359_v32, 0.0  ;;  %v1744_v31 = vld [vmem:[#allocation2 + $0x98] sm:$0xf0]  ;;  %v1718_v32 = vld [vmem:[#allocation2 + $0x60] sm:$0xf]  ;;  %v1547_v25 = vor.u32 %v1814_v18, %v1544_v19 }
 0x10a   : > { %v553_v35 = vpack.c.bf16 %v517_v30, %v516_v29  ;;  %v1739_v29 = vor.u32 %v1862_v22, %v1736_v23  ;;  %v1865_v30 = vld [vmem:[#allocation2 + $0x94] sm:$0xf0]  ;;  %v1847_v21 = vld [vmem:[#allocation2 + $0xc] sm:$0xf]  ;;  %v1834_v18 = vld [vmem:[#allocation2 + $0xa4] sm:$0xf] }
 0x10b   : > { %v554_v36 = vpack.c.bf16 %v519_v34, %v518_v33  ;;  %v1774_v12 = vld [vmem:[#allocation2 + $0xc8] sm:$0xf]  ;;  %v1871_v13 = vld [vmem:[#allocation2 + $0xcc] sm:$0xf]  ;;  %v1860_v33 = vld [vmem:[#allocation2 + $0x6c] sm:$0xf0] }
 0x10c   : > { %585 = vst [vmem:[#allocation2 + $0xd8] sm:$0xff] %v553_v35  ;;  %v1872_v61 = vld [vmem:[#allocation2 + $0xcc] sm:$0xf0]  ;;  %v1768_v62 = vld [vmem:[#allocation2 + $0xd0] sm:$0xf0] }
 0x10d   : > { %586 = vst [vmem:[#allocation2 + $0xe0] sm:$0xff] %v554_v36  ;;  %v1767_v4 = vor.u32 %v1872_v61, %v1766_v58  ;;  %v1771_v5 = vor.u32 %v1870_v59, %v1768_v62  ;;  %v1858_v34 = vld [vmem:[#allocation2 + $0x64] sm:$0xf]  ;;  %v1720_v35 = vld [vmem:[#allocation2 + $0x70] sm:$0xf0] }
 0x10e   : > { %v1742_v36 = vld [vmem:[#allocation2 + $0x88] sm:$0xf]  ;;  %v1850_v58 = vld [vmem:[#allocation2 + $0x24] sm:$0xf]  ;;  %v1688_v59 = vld [vmem:[#allocation2 + $0x30] sm:$0xf0] }
 0x10f   : > { %v408_v37 = vpop.f32.mrf.mxu2  ;;  %v457_v38 = vpop.f32.mrf.mxu3  ;;  %v1855_v61 = vld [vmem:[#allocation2 + $0x4c] sm:$0xf]  ;;  %v1624_v19 = vld [vmem:[#allocation2 + $0xb0] sm:$0xf0] }
 0x110   : > { %v520_v39 = vmax.f32 %v408_v37, 0.0  ;;  %v521_v40 = vmax.f32 %v457_v38, 0.0  ;;  %v312_v41 = vpop.f32.mrf.mxu0  ;;  %v361_v42 = vpop.f32.mrf.mxu1  ;;  %v1863_v37 = vld [vmem:[#allocation2 + $0x8c] sm:$0xf]  ;;  %v1743_v38 = vor.u32 %v1865_v30, %v1742_v36 }
 0x111   : > { %v522_v43 = vmax.f32 %v312_v41, 0.0  ;;  %v523_v44 = vmax.f32 %v361_v42, 0.0  ;;  %v1723_v41 = vor.u32 %v1858_v34, %v1720_v35  ;;  %v1861_v42 = vld [vmem:[#allocation2 + $0x74] sm:$0xf0]  ;;  %v1818_v34 = vld [vmem:[#allocation2 + $0x24] sm:$0xf] }
 0x112   : > { %v555_v45 = vpack.c.bf16 %v521_v40, %v520_v39  ;;  %v1747_v39 = vor.u32 %v1863_v37, %v1744_v31  ;;  %v1719_v40 = vor.u32 %v1860_v33, %v1718_v32  ;;  %v1558_v32 = vld [vmem:[#allocation2 + $0x20] sm:$0xf]  ;;  %v1820_v33 = vld [vmem:[#allocation2 + $0x2c] sm:$0xf0]  ;;  %v1560_v35 = vld [vmem:[#allocation2 + $0x30] sm:$0xf0] }
 0x113   : > { %v556_v46 = vpack.c.bf16 %v523_v44, %v522_v43  ;;  %v1873_v6 = vld [vmem:[#allocation2 + $0xd4] sm:$0xf0]  ;;  %v1776_v7 = vld [vmem:[#allocation2 + $0xd8] sm:$0xf0]  ;;  %v1702_v44 = vld [vmem:[#allocation2 + $0x40] sm:$0xf]  ;;  %v1559_v36 = vor.u32 %v1820_v33, %v1558_v32  ;;  %v1563_v37 = vor.u32 %v1818_v34, %v1560_v35 }
 0x114   : > { %587 = vst [vmem:[#allocation2 + $0xe8] sm:$0xff] %v555_v45  ;;  %v1782_v52 = vld [vmem:[#allocation2 + $0xe0] sm:$0xf]  ;;  %v1874_v53 = vld [vmem:[#allocation2 + $0xe4] sm:$0xf]  ;;  %v1775_v14 = vor.u32 %v1873_v6, %v1774_v12  ;;  %v1779_v15 = vor.u32 %v1871_v13, %v1776_v7 }
 0x115   : > { %588 = vst [vmem:[#allocation2 + $0xf0] sm:$0xff] %v556_v46  ;;  %v1728_v43 = vld [vmem:[#allocation2 + $0x78] sm:$0xf0]  ;;  %v1856_v45 = vld [vmem:[#allocation2 + $0x4c] sm:$0xf0] }
 0x116   : > { %v1854_v46 = vld [vmem:[#allocation2 + $0x44] sm:$0xf]  ;;  %v1672_v7 = vld [vmem:[#allocation2 + $0x10] sm:$0xf0]  ;;  %v1841_v34 = vld [vmem:[#allocation2 + $0xd4] sm:$0xf0] }
 0x117   : > { %v410_v47 = vpop.f32.mrf.mxu2  ;;  %v459_v48 = vpop.f32.mrf.mxu3  ;;  %v1846_v6 = vld [vmem:[#allocation2 + $0x4] sm:$0xf]  ;;  %v1648_v35 = vld [vmem:[#allocation2 + $0xd8] sm:$0xf0] }
 0x118   : > { %v524_v49 = vmax.f32 %v410_v47, 0.0  ;;  %v525_v50 = vmax.f32 %v459_v48, 0.0  ;;  %v1704_v47 = vld [vmem:[#allocation2 + $0x50] sm:$0xf0]  ;;  %v1726_v48 = vld [vmem:[#allocation2 + $0x68] sm:$0xf]  ;;  %v1675_v13 = vor.u32 %v1846_v6, %v1672_v7 }
 0x119   : > { %v1830_v6 = vld [vmem:[#allocation2 + $0x84] sm:$0xf]  ;;  %v1608_v7 = vld [vmem:[#allocation2 + $0x90] sm:$0xf0] }
 0x11a   : > { %v557_v51 = vpack.c.bf16 %v525_v50, %v524_v49  ;;  %v1859_v49 = vld [vmem:[#allocation2 + $0x6c] sm:$0xf]  ;;  %v1727_v50 = vor.u32 %v1861_v42, %v1726_v48 }
 0x11b   : > { %v1790_v60 = vld [vmem:[#allocation2 + $0xe8] sm:$0xf]  ;;  %v1875_v0 = vld [vmem:[#allocation2 + $0xec] sm:$0xf] }
 0x11c   : > { %589 = vst [vmem:[#allocation2 + $0xf8] sm:$0xff] %v557_v51  ;;  %v1876_v54 = vld [vmem:[#allocation2 + $0xec] sm:$0xf0]  ;;  %v1784_v55 = vld [vmem:[#allocation2 + $0xf0] sm:$0xf0]  ;;  %v1731_v51 = vor.u32 %v1859_v49, %v1728_v43 }
 0x11d   : > { %v1783_v56 = vor.u32 %v1876_v54, %v1782_v52  ;;  %v1787_v57 = vor.u32 %v1874_v53, %v1784_v55  ;;  %v1703_v52 = vor.u32 %v1856_v45, %v1702_v44  ;;  %v1707_v53 = vor.u32 %v1854_v46, %v1704_v47  ;;  %v1857_v54 = vld [vmem:[#allocation2 + $0x54] sm:$0xf0]  ;;  %v1712_v55 = vld [vmem:[#allocation2 + $0x58] sm:$0xf0]  ;;  %v1574_v44 = vld [vmem:[#allocation2 + $0x40] sm:$0xf] }
 0x11e   : > { %v1824_v45 = vld [vmem:[#allocation2 + $0x4c] sm:$0xf0]  ;;  %v1822_v46 = vld [vmem:[#allocation2 + $0x44] sm:$0xf]  ;;  %v1576_v47 = vld [vmem:[#allocation2 + $0x50] sm:$0xf0] }
 0x11f   : > { %980 = vmatpush.bf16.xpose.msrb.mxu0 %v1783_v56  ;;  %1029 = vmatpush.bf16.xpose.msrb.mxu1 %v1787_v57  ;;  %v1686_v56 = vld [vmem:[#allocation2 + $0x20] sm:$0xf]  ;;  %v1852_v57 = vld [vmem:[#allocation2 + $0x2c] sm:$0xf0]  ;;  %v1575_v48 = vor.u32 %v1824_v45, %v1574_v44  ;;  %v1579_v49 = vor.u32 %v1822_v46, %v1576_v47 }
 0x123   : > { %v1877_v63 = vld [vmem:[#allocation2 + $0xf4] sm:$0xf0]  ;;  %v1792_v1 = vld [vmem:[#allocation2 + $0xf8] sm:$0xf0] }
 0x124   : > { %v1791_v2 = vor.u32 %v1877_v63, %v1790_v60  ;;  %v1795_v3 = vor.u32 %v1875_v0, %v1792_v1  ;;  %v1710_v60 = vld [vmem:[#allocation2 + $0x48] sm:$0xf]  ;;  %v1715_v63 = vor.u32 %v1855_v61, %v1712_v55  ;;  %v1687_v0 = vor.u32 %v1852_v57, %v1686_v56  ;;  %v1590_v56 = vld [vmem:[#allocation2 + $0x60] sm:$0xf]  ;;  %v1828_v57 = vld [vmem:[#allocation2 + $0x6c] sm:$0xf0] }
 0x125   : > { %v1711_v62 = vor.u32 %v1857_v54, %v1710_v60  ;;  %v1691_v1 = vor.u32 %v1850_v58, %v1688_v59  ;;  %v1826_v58 = vld [vmem:[#allocation2 + $0x64] sm:$0xf]  ;;  %v1592_v59 = vld [vmem:[#allocation2 + $0x70] sm:$0xf0]  ;;  %v1591_v60 = vor.u32 %v1828_v57, %v1590_v56  ;;  %v1845_v46 = vld [vmem:[#allocation2 + $0xf4] sm:$0xf0] }
 0x126   : > { %1078 = vmatpush.bf16.xpose.msrb.mxu2 %v1791_v2  ;;  %1127 = vmatpush.bf16.xpose.msrb.mxu3 %v1795_v3  ;;  %v1853_v2 = vld [vmem:[#allocation2 + $0x34] sm:$0xf0]  ;;  %v1696_v3 = vld [vmem:[#allocation2 + $0x38] sm:$0xf0]  ;;  %v1595_v61 = vor.u32 %v1826_v58, %v1592_v59 }
 0x127   : > { %981 = vmatpush.bf16.xpose.msrb.mxu0 %v1767_v4  ;;  %1030 = vmatpush.bf16.xpose.msrb.mxu1 %v1771_v5  ;;  %v1670_v4 = vld [vmem:[#allocation2] sm:$0xf]  ;;  %v1848_v5 = vld [vmem:[#allocation2 + $0xc] sm:$0xf0]  ;;  %v1695_v10 = vor.u32 %v1853_v2, %v1694_v8  ;;  %v1699_v11 = vor.u32 %v1851_v9, %v1696_v3  ;;  %v1611_v9 = vor.u32 %v1830_v6, %v1608_v7  ;;  %v1664_v47 = vld [vmem:[#allocation2 + $0xf8] sm:$0xf0] }
 0x128   : > { %v1671_v12 = vor.u32 %v1848_v5, %v1670_v4  ;;  %v1606_v4 = vld [vmem:[#allocation2 + $0x80] sm:$0xf]  ;;  %v1832_v5 = vld [vmem:[#allocation2 + $0x8c] sm:$0xf0] }
 0x129   : > { %v1607_v8 = vor.u32 %v1832_v5, %v1606_v4 }
 0x12e   : > { %1079 = vmatpush.bf16.xpose.msrb.mxu2 %v1775_v14  ;;  %1128 = vmatpush.bf16.xpose.msrb.mxu3 %v1779_v15  ;;  %v1849_v14 = vld [vmem:[#allocation2 + $0x14] sm:$0xf0]  ;;  %v1680_v15 = vld [vmem:[#allocation2 + $0x18] sm:$0xf0] }
 0x12f   : > { %982 = vmatpush.bf16.xpose.msrb.mxu0 %v1751_v16  ;;  %1031 = vmatpush.bf16.xpose.msrb.mxu1 %v1755_v17  ;;  %v1542_v16 = vld [vmem:[#allocation2] sm:$0xf]  ;;  %v1816_v17 = vld [vmem:[#allocation2 + $0xc] sm:$0xf0]  ;;  %v1679_v22 = vor.u32 %v1849_v14, %v1678_v20  ;;  %v1683_v23 = vor.u32 %v1847_v21, %v1680_v15  ;;  %v1627_v21 = vor.u32 %v1834_v18, %v1624_v19 }
 0x130   : > { %v1543_v24 = vor.u32 %v1816_v17, %v1542_v16  ;;  %v1622_v16 = vld [vmem:[#allocation2 + $0xa0] sm:$0xf]  ;;  %v1836_v17 = vld [vmem:[#allocation2 + $0xac] sm:$0xf0] }
 0x131   : > { %v1623_v20 = vor.u32 %v1836_v17, %v1622_v16 }
 0x136   : > { %1080 = vmatpush.bf16.xpose.msrb.mxu2 %v1759_v26  ;;  %1129 = vmatpush.bf16.xpose.msrb.mxu3 %v1763_v27  ;;  %v1817_v26 = vld [vmem:[#allocation2 + $0x14] sm:$0xf0]  ;;  %v1552_v27 = vld [vmem:[#allocation2 + $0x18] sm:$0xf0] }
 0x137   : > { %983 = vmatpush.bf16.xpose.msrb.mxu0 %v1735_v28  ;;  %1032 = vmatpush.bf16.xpose.msrb.mxu1 %v1739_v29  ;;  %v1550_v28 = vld [vmem:[#allocation2 + $0x8] sm:$0xf]  ;;  %v1815_v29 = vld [vmem:[#allocation2 + $0xc] sm:$0xf] }
 0x138   : > { %v1551_v30 = vor.u32 %v1817_v26, %v1550_v28  ;;  %v1555_v31 = vor.u32 %v1815_v29, %v1552_v27  ;;  %v1638_v28 = vld [vmem:[#allocation2 + $0xc0] sm:$0xf]  ;;  %v1840_v29 = vld [vmem:[#allocation2 + $0xcc] sm:$0xf0] }
 0x139   : > { %v1639_v32 = vor.u32 %v1840_v29, %v1638_v28 }
 0x13e   : > { %1081 = vmatpush.bf16.xpose.msrb.mxu2 %v1743_v38  ;;  %1130 = vmatpush.bf16.xpose.msrb.mxu3 %v1747_v39  ;;  %v1821_v38 = vld [vmem:[#allocation2 + $0x34] sm:$0xf0]  ;;  %v1568_v39 = vld [vmem:[#allocation2 + $0x38] sm:$0xf0] }
 0x13f   : > { %984 = vmatpush.bf16.xpose.msrb.mxu0 %v1719_v40  ;;  %1033 = vmatpush.bf16.xpose.msrb.mxu1 %v1723_v41  ;;  %v1566_v40 = vld [vmem:[#allocation2 + $0x28] sm:$0xf]  ;;  %v1819_v41 = vld [vmem:[#allocation2 + $0x2c] sm:$0xf] }
 0x140   : > { %v1567_v42 = vor.u32 %v1821_v38, %v1566_v40  ;;  %v1571_v43 = vor.u32 %v1819_v41, %v1568_v39  ;;  %v1654_v40 = vld [vmem:[#allocation2 + $0xe0] sm:$0xf]  ;;  %v1844_v41 = vld [vmem:[#allocation2 + $0xec] sm:$0xf0] }
 0x141   : > { %v1655_v44 = vor.u32 %v1844_v41, %v1654_v40 }
 0x146   : > { %1082 = vmatpush.bf16.xpose.msrb.mxu2 %v1727_v50  ;;  %1131 = vmatpush.bf16.xpose.msrb.mxu3 %v1731_v51  ;;  %v1825_v50 = vld [vmem:[#allocation2 + $0x54] sm:$0xf0]  ;;  %v1584_v51 = vld [vmem:[#allocation2 + $0x58] sm:$0xf0] }
 0x147   : > { %985 = vmatpush.bf16.xpose.msrb.mxu0 %v1703_v52  ;;  %1034 = vmatpush.bf16.xpose.msrb.mxu1 %v1707_v53  ;;  %v1582_v52 = vld [vmem:[#allocation2 + $0x48] sm:$0xf]  ;;  %v1823_v53 = vld [vmem:[#allocation2 + $0x4c] sm:$0xf] }
 0x148   : > { %v1583_v54 = vor.u32 %v1825_v50, %v1582_v52  ;;  %v1587_v55 = vor.u32 %v1823_v53, %v1584_v51 }
 0x14e   : > { %1083 = vmatpush.bf16.xpose.msrb.mxu2 %v1711_v62  ;;  %1132 = vmatpush.bf16.xpose.msrb.mxu3 %v1715_v63  ;;  %v1829_v62 = vld [vmem:[#allocation2 + $0x74] sm:$0xf0]  ;;  %v1600_v63 = vld [vmem:[#allocation2 + $0x78] sm:$0xf0] }
 0x14f   : > { %986 = vmatpush.bf16.xpose.msrb.mxu0 %v1687_v0  ;;  %1035 = vmatpush.bf16.xpose.msrb.mxu1 %v1691_v1  ;;  %v1598_v0 = vld [vmem:[#allocation2 + $0x68] sm:$0xf]  ;;  %v1827_v1 = vld [vmem:[#allocation2 + $0x6c] sm:$0xf] }
 0x150   : > { %v1599_v2 = vor.u32 %v1829_v62, %v1598_v0  ;;  %v1603_v3 = vor.u32 %v1827_v1, %v1600_v63 }
 0x156   : > { %1084 = vmatpush.bf16.xpose.msrb.mxu2 %v1695_v10  ;;  %1133 = vmatpush.bf16.xpose.msrb.mxu3 %v1699_v11  ;;  %v1833_v10 = vld [vmem:[#allocation2 + $0x94] sm:$0xf0]  ;;  %v1616_v11 = vld [vmem:[#allocation2 + $0x98] sm:$0xf0] }
 0x157   : > { %987 = vmatpush.bf16.xpose.msrb.mxu0 %v1671_v12  ;;  %1036 = vmatpush.bf16.xpose.msrb.mxu1 %v1675_v13  ;;  %v1614_v12 = vld [vmem:[#allocation2 + $0x88] sm:$0xf]  ;;  %v1831_v13 = vld [vmem:[#allocation2 + $0x8c] sm:$0xf] }
 0x158   : > { %v1615_v14 = vor.u32 %v1833_v10, %v1614_v12  ;;  %v1619_v15 = vor.u32 %v1831_v13, %v1616_v11 }
 0x15e   : > { %1085 = vmatpush.bf16.xpose.msrb.mxu2 %v1679_v22  ;;  %1134 = vmatpush.bf16.xpose.msrb.mxu3 %v1683_v23  ;;  %v1837_v22 = vld [vmem:[#allocation2 + $0xb4] sm:$0xf0]  ;;  %v1632_v23 = vld [vmem:[#allocation2 + $0xb8] sm:$0xf0] }
 0x15f   : > { %988 = vmatmul.bf16.vlgmr.msrb.gmra.mxu0 %v1543_v24  ;;  %1037 = vmatmul.bf16.vlgmr.msrb.gmra.mxu1 %v1547_v25  ;;  %v1630_v24 = vld [vmem:[#allocation2 + $0xa8] sm:$0xf]  ;;  %v1835_v25 = vld [vmem:[#allocation2 + $0xac] sm:$0xf] }
 0x160   : > { %v1631_v26 = vor.u32 %v1837_v22, %v1630_v24  ;;  %v1635_v27 = vor.u32 %v1835_v25, %v1632_v23 }
 0x165   : > { %1086 = vmatmul.bf16.vlgmr.msrb.gmra.mxu2 %v1551_v30  ;;  %1135 = vmatmul.bf16.vlgmr.msrb.gmra.mxu3 %v1555_v31  ;;  %v1838_v30 = vld [vmem:[#allocation2 + $0xc4] sm:$0xf]  ;;  %v1640_v31 = vld [vmem:[#allocation2 + $0xd0] sm:$0xf0] }
 0x166   : > { %v1643_v33 = vor.u32 %v1838_v30, %v1640_v31 }
 0x16f   : > { %993 = vmatmul.bf16.gmra.mxu0 %v1559_v36  ;;  %1042 = vmatmul.bf16.gmra.mxu1 %v1563_v37  ;;  %v1646_v36 = vld [vmem:[#allocation2 + $0xc8] sm:$0xf]  ;;  %v1839_v37 = vld [vmem:[#allocation2 + $0xcc] sm:$0xf] }
 0x170   : > { %v1647_v38 = vor.u32 %v1841_v34, %v1646_v36  ;;  %v1651_v39 = vor.u32 %v1839_v37, %v1648_v35 }
 0x175   : > { %1091 = vmatmul.bf16.gmra.mxu2 %v1567_v42  ;;  %1140 = vmatmul.bf16.gmra.mxu3 %v1571_v43  ;;  %v1842_v42 = vld [vmem:[#allocation2 + $0xe4] sm:$0xf]  ;;  %v1656_v43 = vld [vmem:[#allocation2 + $0xf0] sm:$0xf0] }
 0x176   : > { %v1659_v45 = vor.u32 %v1842_v42, %v1656_v43 }
 0x17f   : > { %998 = vmatmul.bf16.gmra.mxu0 %v1575_v48  ;;  %1047 = vmatmul.bf16.gmra.mxu1 %v1579_v49  ;;  %v1662_v48 = vld [vmem:[#allocation2 + $0xe8] sm:$0xf]  ;;  %v1843_v49 = vld [vmem:[#allocation2 + $0xec] sm:$0xf] }
 0x180   : > { %v1663_v50 = vor.u32 %v1845_v46, %v1662_v48  ;;  %v1667_v51 = vor.u32 %v1843_v49, %v1664_v47 }
 0x185   : > { %1096 = vmatmul.bf16.gmra.mxu2 %v1583_v54  ;;  %1145 = vmatmul.bf16.gmra.mxu3 %v1587_v55 }
 0x18f   : > { %1003 = vmatmul.bf16.gmra.mxu0 %v1591_v60  ;;  %1052 = vmatmul.bf16.gmra.mxu1 %v1595_v61 }
 0x195   : > { %1101 = vmatmul.bf16.gmra.mxu2 %v1599_v2  ;;  %1150 = vmatmul.bf16.gmra.mxu3 %v1603_v3 }
 0x19f   : > { %1008 = vmatmul.bf16.gmra.mxu0 %v1607_v8  ;;  %1057 = vmatmul.bf16.gmra.mxu1 %v1611_v9 }
 0x1a5   : > { %1106 = vmatmul.bf16.gmra.mxu2 %v1615_v14  ;;  %1155 = vmatmul.bf16.gmra.mxu3 %v1619_v15 }
 0x1af   : > { %1013 = vmatmul.bf16.gmra.mxu0 %v1623_v20  ;;  %1062 = vmatmul.bf16.gmra.mxu1 %v1627_v21 }
 0x1b5   : > { %1111 = vmatmul.bf16.gmra.mxu2 %v1631_v26  ;;  %1160 = vmatmul.bf16.gmra.mxu3 %v1635_v27 }
 0x1bf   : > { %1018 = vmatmul.bf16.gmra.mxu0 %v1639_v32  ;;  %1067 = vmatmul.bf16.gmra.mxu1 %v1643_v33 }
 0x1c5   : > { %1116 = vmatmul.bf16.gmra.mxu2 %v1647_v38  ;;  %1165 = vmatmul.bf16.gmra.mxu3 %v1651_v39 }
 0x1cf   : > { %1023 = vmatmul.bf16.gmra.mxu0 %v1655_v44  ;;  %1072 = vmatmul.bf16.gmra.mxu1 %v1659_v45 }
 0x1d5   : > { %1121 = vmatmul.bf16.gmra.mxu2 %v1663_v50  ;;  %1170 = vmatmul.bf16.gmra.mxu3 %v1667_v51 }
 0x1dc   : > { %v989_v52 = vpop.f32.mrf.mxu0  ;;  %v1038_v53 = vpop.f32.mrf.mxu1 }
 0x1dd   : > { %v1039_v56 = vadd.f32 %v1038_v53, %v989_v52 }
 0x1e4   : > { %v991_v54 = vpop.f32.mrf.mxu0  ;;  %v1040_v55 = vpop.f32.mrf.mxu1 }
 0x1e8   : > { %v1087_v57 = vpop.f32.mrf.mxu2  ;;  %v1136_v58 = vpop.f32.mrf.mxu3 }
 0x1e9   : > { %v1088_v59 = vadd.f32 %v1087_v57, %v1039_v56 }
 0x1eb   : > { %v1137_v60 = vadd.f32 %v1136_v58, %v1088_v59 }
 0x1ec   : > { %v994_v61 = vpop.f32.mrf.mxu0  ;;  %v1043_v62 = vpop.f32.mrf.mxu1 }
 0x1ed   : > { %v1225_v63 = vmax.f32 %v1137_v60, -1e+30 }
 0x1ef   : > { %v1229_v0 = vmax.f32 %v1225_v63, -1e+30 }
 0x1f0   : > { %v1089_v1 = vpop.f32.mrf.mxu2  ;;  %v1138_v2 = vpop.f32.mrf.mxu3 }
 0x1f1   : > { %v1233_v3 = vmax.f32 %v1229_v0, -1e+30 }
 0x1f3   : > { %v1237_v4 = vmax.f32 %v1233_v3, -1e+30 }
 0x1f4   : > { %v996_v5 = vpop.f32.mrf.mxu0  ;;  %v1045_v6 = vpop.f32.mrf.mxu1 }
 0x1f5   : > { %v1239_v7 = vmax.f32 %v1237_v4, -1e+30 }
 0x1f7   : > { %v1240_v8 = vrot.slane %v1239_v7, 4 }
 0x1f8   : > { %v1092_v9 = vpop.f32.mrf.mxu2  ;;  %v1141_v10 = vpop.f32.mrf.mxu3 }
 0x1f9   : > { %v1241_v11 = vmax.f32 %v1239_v7, %v1240_v8 }
 0x1fb   : > { %v1242_v12 = vrot.slane %v1241_v11, 2 }
 0x1fc   : > { %v999_v13 = vpop.f32.mrf.mxu0  ;;  %v1048_v14 = vpop.f32.mrf.mxu1 }
 0x1fd   : > { %v1243_v15 = vmax.f32 %v1241_v11, %v1242_v12 }
 0x1ff   : > { %v1244_v16 = vrot.slane %v1243_v15, 1 }
 0x200   : > { %v1094_v17 = vpop.f32.mrf.mxu2  ;;  %v1143_v18 = vpop.f32.mrf.mxu3 }
 0x201   : > { %v1245_v19 = vmax.f32 %v1243_v15, %v1244_v16 }
 0x203   : > { %v1246_v20 = vsub.f32 %v1137_v60, %v1245_v19  ;;  %v1247_v21 = vsub.f32 -1e+30, %v1245_v19 }
 0x204   : > { %v1001_v22 = vpop.f32.mrf.mxu0  ;;  %v1050_v23 = vpop.f32.mrf.mxu1 }
 0x205   : > { %v1262_v24 = vmul.f32 1.442695, %v1246_v20  ;;  %v1264_v25 = vmul.f32 1.442695, %v1247_v21 }
 0x207   : > { %1936 = vpow2.f32 %v1262_v24 }
 0x208   : > { %1938 = vpow2.f32 %v1264_v25  ;;  %v1097_v26 = vpop.f32.mrf.mxu2  ;;  %v1146_v27 = vpop.f32.mrf.mxu3 }
 0x20c   : > { %v1004_v28 = vpop.f32.mrf.mxu0  ;;  %v1053_v29 = vpop.f32.mrf.mxu1 }
 0x20d   : > { %v2165_v30 = vpop.eup %1936 }
 0x20e   : > { %v2167_v31 = vpop.eup %1938 }
 0x20f   : > { %v1294_v32 = vadd.f32 %v2167_v31, %v2165_v30 }
 0x210   : > { %v1099_v33 = vpop.f32.mrf.mxu2  ;;  %v1148_v34 = vpop.f32.mrf.mxu3 }
 0x211   : > { %v1295_v35 = vadd.f32 %v2167_v31, %v1294_v32 }
 0x213   : > { %v1296_v36 = vadd.f32 %v2167_v31, %v1295_v35 }
 0x214   : > { %v1006_v37 = vpop.f32.mrf.mxu0  ;;  %v1055_v38 = vpop.f32.mrf.mxu1 }
 0x215   : > { %v1297_v39 = vadd.f32 %v2167_v31, %v1296_v36 }
 0x217   : > { %v1298_v40 = vadd.f32 %v2167_v31, %v1297_v39 }
 0x218   : > { %v1102_v41 = vpop.f32.mrf.mxu2  ;;  %v1151_v42 = vpop.f32.mrf.mxu3 }
 0x219   : > { %v1299_v43 = vadd.f32 %v2167_v31, %v1298_v40 }
 0x21b   : > { %v1300_v44 = vadd.f32 %v2167_v31, %v1299_v43 }
 0x21c   : > { %v1009_v45 = vpop.f32.mrf.mxu0  ;;  %v1058_v46 = vpop.f32.mrf.mxu1 }
 0x21d   : > { %v1301_v47 = vadd.f32 %v2167_v31, %v1300_v44 }
 0x21f   : > { %v1302_v48 = vadd.f32 %v2167_v31, %v1301_v47 }
 0x220   : > { %v1104_v49 = vpop.f32.mrf.mxu2  ;;  %v1153_v50 = vpop.f32.mrf.mxu3 }
 0x221   : > { %v1303_v51 = vadd.f32 %v2167_v31, %v1302_v48 }
 0x223   : > { %v1304_v52 = vadd.f32 %v2167_v31, %v1303_v51 }
 0x224   : > { %v1011_v53 = vpop.f32.mrf.mxu0  ;;  %v1060_v54 = vpop.f32.mrf.mxu1 }
 0x225   : > { %v1305_v55 = vadd.f32 %v2167_v31, %v1304_v52 }
 0x227   : > { %v1306_v56 = vadd.f32 %v2167_v31, %v1305_v55 }
 0x228   : > { %v1107_v57 = vpop.f32.mrf.mxu2  ;;  %v1156_v58 = vpop.f32.mrf.mxu3 }
 0x229   : > { %v1307_v59 = vadd.f32 %v2167_v31, %v1306_v56 }
 0x22b   : > { %v1308_v60 = vadd.f32 %v2167_v31, %v1307_v59 }
 0x22c   : > { %v1014_v61 = vpop.f32.mrf.mxu0  ;;  %v1063_v62 = vpop.f32.mrf.mxu1 }
 0x22d   : > { %v1309_v63 = vrot.slane %v1308_v60, 4 }
 0x22f   : > { %v1310_v0 = vadd.f32 %v1309_v63, %v1308_v60 }
 0x230   : > { %v1109_v1 = vpop.f32.mrf.mxu2  ;;  %v1158_v2 = vpop.f32.mrf.mxu3 }
 0x231   : > { %v1311_v3 = vrot.slane %v1310_v0, 2 }
 0x233   : > { %v1312_v4 = vadd.f32 %v1311_v3, %v1310_v0 }
 0x234   : > { %v1016_v5 = vpop.f32.mrf.mxu0  ;;  %v1065_v6 = vpop.f32.mrf.mxu1 }
 0x235   : > { %v1313_v7 = vrot.slane %v1312_v4, 1 }
 0x237   : > { %v1314_v8 = vadd.f32 %v1313_v7, %v1312_v4 }
 0x238   : > { %v1112_v9 = vpop.f32.mrf.mxu2  ;;  %v1161_v10 = vpop.f32.mrf.mxu3 }
 0x239   : > { %1940 = vrcp.f32 %v1314_v8  ;;  %v1326_v18 = vand.u32 2147483648, %v1314_v8  ;;  %v1324_v20 = vand.u32 2147483647, %v1314_v8  ;;  %vm1320_vm2 = vweird.f32 %v1314_v8 }
 0x23b   : > { %v1327_v24 = vor.u32 1.1754944e-38, %v1326_v18  ;;  %vm1325_vm4 = vcmp.eq.f32.partialorder %v1324_v20, 8.507059e+37 }
 0x23c   : > { %v1019_v11 = vpop.f32.mrf.mxu0  ;;  %v1068_v12 = vpop.f32.mrf.mxu1 }
 0x23f   : > { %v1941_v13 = vpop.eup %1940 }
 0x240   : > { %v1316_v14 = vmul.f32 %v1941_v13, %v1314_v8  ;;  %v1114_v15 = vpop.f32.mrf.mxu2  ;;  %v1163_v16 = vpop.f32.mrf.mxu3  ;;  %vm1321_vm1 = vweird.f32 %v1941_v13 }
 0x241   : > { %vm1322_vm3 = vmor %vm1320_vm2, %vm1321_vm1 }
 0x242   : > { %v1317_v17 = vsub.f32 1.0, %v1316_v14 }
 0x244   : > { %v1318_v19 = vmul.f32 %v1941_v13, %v1317_v17  ;;  %v1021_v21 = vpop.f32.mrf.mxu0  ;;  %v1070_v22 = vpop.f32.mrf.mxu1 }
 0x246   : > { %v1319_v23 = vadd.f32 %v1941_v13, %v1318_v19 }
 0x248   : > { %v1323_v25 = vsel %vm1322_vm3, %v1941_v13, %v1319_v23  ;;  %v1117_v26 = vpop.f32.mrf.mxu2  ;;  %v1166_v27 = vpop.f32.mrf.mxu3 }
 0x249   : > { %v1328_v28 = vsel %vm1325_vm4, %v1327_v24, %v1323_v25 }
 0x24a   : > { %v1329_v29 = vmul.f32 %v2165_v30, %v1328_v28  ;;  %v1330_v32 = vmul.f32 %v2167_v31, %v1328_v28 }
 0x24c   : > { %1345 = vst [vmem:[%s150_s28] sm:$0xff] %v1329_v29  ;;  %v1024_v33 = vpop.f32.mrf.mxu0  ;;  %v1073_v34 = vpop.f32.mrf.mxu1 }
 0x24d   : > { %1346 = vst [vmem:[%s150_s28 + $0x8] sm:$0xff] %v1330_v32 }
 0x24e   : > { %1347 = vst [vmem:[%s150_s28 + $0x10] sm:$0xff] %v1330_v32 }
 0x24f   : > { %1348 = vst [vmem:[%s150_s28 + $0x18] sm:$0xff] %v1330_v32 }
 0x250   : > { %1349 = vst [vmem:[%s150_s28 + $0x20] sm:$0xff] %v1330_v32  ;;  %v1119_v35 = vpop.f32.mrf.mxu2  ;;  %v1168_v36 = vpop.f32.mrf.mxu3 }
 0x251   : > { %1350 = vst [vmem:[%s150_s28 + $0x28] sm:$0xff] %v1330_v32 }
 0x252   : > { %1351 = vst [vmem:[%s150_s28 + $0x30] sm:$0xff] %v1330_v32 }
 0x253   : > { %1352 = vst [vmem:[%s150_s28 + $0x38] sm:$0xff] %v1330_v32 }
 0x254   : > { %1353 = vst [vmem:[%s150_s28 + $0x40] sm:$0xff] %v1330_v32  ;;  %v1026_v30 = vpop.f32.mrf.mxu0  ;;  %v1075_v31 = vpop.f32.mrf.mxu1 }
 0x255   : > { %1354 = vst [vmem:[%s150_s28 + $0x48] sm:$0xff] %v1330_v32 }
 0x256   : > { %1355 = vst [vmem:[%s150_s28 + $0x50] sm:$0xff] %v1330_v32 }
 0x257   : > { %1356 = vst [vmem:[%s150_s28 + $0x58] sm:$0xff] %v1330_v32 }
 0x258   : > { %1357 = vst [vmem:[%s150_s28 + $0x60] sm:$0xff] %v1330_v32  ;;  %v1122_v37 = vpop.f32.mrf.mxu2  ;;  %v1171_v38 = vpop.f32.mrf.mxu3 }
 0x259   : > { %1358 = vst [vmem:[%s150_s28 + $0x68] sm:$0xff] %v1330_v32 }
 0x25a   : > { %1359 = vst [vmem:[%s150_s28 + $0x70] sm:$0xff] %v1330_v32 }
 0x25b   : > { %1360 = vst [vmem:[%s150_s28 + $0x78] sm:$0xff] %v1330_v32 }
 0x25c   : > { %1969 = shalt.err (!%p1966_p5)
}
 0x25d   : > { %s2022_s24 = smov 128   ;;  %s2023_s25 = smov 8  }
 0x25e   : > { %1879 = dma.vmem_to_hbm [thread:$0]  (%p2079_p4), %s1376_s5, 2048, %s1378_s6, %s1362_s12, %s2022_s24, %s2022_s24, %s2023_s25  }
 0x260   : > { %v1124_v39 = vpop.f32.mrf.mxu2  ;;  %v1173_v40 = vpop.f32.mrf.mxu3 }
 0x261 PF: > { %p1885_p6 = scmp.ge.s32.totalorder %s2020_s14, 2  ;;  %s1392_s26 = sand.u32 1, %s2000_s9  }
 0x262   : > { %s1393_s27 = scalar_lea.sflag [#allocation4], %s1392_s26 }
 0x263   : > { %p1882_p7 = pnand %p1885_p6, %p2086_p8 }
 0x265   : > { %p1883_p9 = pneg %p1882_p7 }
 0x267   : > { %1995 = dma.done.wait (%p1883_p9), %s1393_s27, 2048  }
 0x268   : > { %1997 = vsyncadd (%p1883_p9), %s1393_s27, 4294965248  ;;  %s15_s14 = sadd.s32 1, %s2020_s14   ;;  %s2233_s9 = smov %s2004_s10 }
 0x269   : > { %p12_p10 = scmp.ge.s32.totalorder %s15_s14, 4   ;;  %s2234_s10 = smov %s2008_s11 }
 0x26a   : > { %s2235_s11 = smov %s2092_s22  ;;  %s2236_s12 = smov %s2016_s13 }
 0x26b   : > { %s2237_s13 = smov %s2239_s17  ;;  %14 = sbr.rel (!%p12_p10) target bundleno = 4 (0x4), region = 68 }
 0x270   :  { %1399 = vsyncpa [#allocation4], 1 }
 0x271   :  { %1401 = vsyncpa [#allocation4 + $0x1], 1 }

</bundles_post_ra>
